<compile_context>
chip_gen: v7x
topology: tpu7x:2x2x1
jax: 0.10.0
libtpu: 0.0.40
codegen_flags: <defaults>
</compile_context>

<pallas_src>
import jax
import jax.numpy as jnp
from jax.experimental import pallas as pl
from jax.experimental.pallas import tpu as pltpu


def _round_up(n, m):
    return ((n + m - 1) // m) * m


def _choose_tile_b(B):
    # Largest tile (multiple of 8) that still leaves >=2 grid steps, so the
    # per-step overhead (~0.35 us) amortizes and the single "parallel" batch
    # axis can be split across v7x's two TensorCores.  For power-of-two B this
    # yields an even grid.  Tiny B gets a single full-batch step.
    for t in (4096, 2048, 1024, 512, 256, 128, 64, 32, 16, 8):
        if B >= 2 * t:
            return t
    return min(4096, _round_up(max(B, 8), 8))


def _mlp_kernel(x_ref, w1_ref, b1_ref, w2_ref, b2_ref, w3_ref, b3_ref, o_ref):
    # Three MXU matmuls (bf16 feeds, f32 accumulation) + VPU ReLU, fused in VMEM.
    x = x_ref[...].astype(jnp.bfloat16)                                   # f32 HBM read, VPU cast
    h = jnp.dot(x, w1_ref[...], preferred_element_type=jnp.float32) + b1_ref[...]
    h = jnp.maximum(h, 0.0).astype(jnp.bfloat16)                          # f32 ReLU, bf16 MXU feed
    h = jnp.dot(h, w2_ref[...], preferred_element_type=jnp.float32) + b2_ref[...]
    h = jnp.maximum(h, 0.0).astype(jnp.bfloat16)
    out = jnp.dot(h, w3_ref[...], preferred_element_type=jnp.float32) + b3_ref[...]
    o_ref[...] = out.astype(o_ref.dtype)                                  # narrow (A-wide) f32 store


def simple_gnn_forward(x, params, *, tile_b=None):
    """Fused MLP forward.

    x: [B, state_dim] float32
    params: w1 [S,64], b1 [1,64], w2 [64,64], b2 [1,64], w3 [64,A], b3 [1,A]
    """
    B, S = x.shape
    H = params["w1"].shape[1]
    A = params["w3"].shape[1]

    # Batch tiling (multiple of 8; pad B only if it is not a tile multiple).
    if tile_b is None:
        tile_b = _choose_tile_b(B)
    assert tile_b % 8 == 0, "tile_b must be a multiple of 8 (f32 sublane)"
    B_pad = _round_up(B, tile_b)
    grid = (B_pad // tile_b,)

    # x stays f32 (kernel casts to bf16); only pad the batch dim when needed.
    x_in = x if B_pad == B else jnp.pad(x, ((0, B_pad - B), (0, 0)))
    w1 = params["w1"].astype(jnp.bfloat16)
    w2 = params["w2"].astype(jnp.bfloat16)
    w3 = params["w3"].astype(jnp.bfloat16)
    b1 = params["b1"].astype(jnp.float32)
    b2 = params["b2"].astype(jnp.float32)
    b3 = params["b3"].astype(jnp.float32)

    # Grid-invariant weights/biases: whole-array resident in VMEM (no
    # per-step double buffering or re-DMA).
    resident = pl.BlockSpec(memory_space=pltpu.MemorySpace.VMEM)

    # Accurate scheduling hint: narrow f32 input, bf16 weights, A-wide output.
    flops = 2 * B_pad * (S * H + H * H + H * A)
    bytes_accessed = (
        B_pad * S * 4                     # x read (f32)
        + (S * H + H * H + H * A) * 2     # bf16 weights
        + (H + H + A) * 4                 # f32 biases
        + B_pad * A * 4                   # output write (f32, no lane padding)
    )

    # VMEM budget from the actual working set (double-buffered x / out tiles,
    # lane-padded VMEM layouts, in-kernel intermediates, resident weights),
    # with ~2x headroom.  Explicit so larger tiles stay safe on v5e (16 MiB
    # default scoped VMEM) without hogging v7x's 64 MiB physical VMEM.
    work_set = (
        2 * tile_b * S * 4                # double-buffered x tiles (f32)
        + 2 * tile_b * 128 * 4            # double-buffered out tiles (VMEM lane-padded)
        + 8 * tile_b * H * 4              # conservative in-kernel f32/bf16 intermediates
        + 512 * 1024                      # resident weights/biases + slack
    )
    vmem_limit = int(min(max(2 * work_set, 4 * 1024 * 1024), 32 * 1024 * 1024))

    out = pl.pallas_call(
        _mlp_kernel,
        out_shape=jax.ShapeDtypeStruct((B_pad, A), jnp.float32),
        grid_spec=pltpu.PrefetchScalarGridSpec(
            num_scalar_prefetch=0,
            grid=grid,
            in_specs=[
                pl.BlockSpec((tile_b, S), lambda i: (i, 0)),   # x tile over batch (f32)
                resident,   # w1
                resident,   # b1
                resident,   # w2
                resident,   # b2
                resident,   # w3
                resident,   # b3
            ],
            # Last dim A equals the full array dim -> legal despite A < 128.
            out_specs=pl.BlockSpec((tile_b, A), lambda i: (i, 0)),
        ),
        compiler_params=pltpu.CompilerParams(
            dimension_semantics=("parallel",),
            vmem_limit_bytes=vmem_limit,
        ),
        cost_estimate=pl.CostEstimate(
            flops=flops, transcendentals=0, bytes_accessed=bytes_accessed),
    )(x_in, w1, b1, w2, b2, w3, b3)

    return out if B_pad == B else out[:B]


def init_params(key, state_dim, action_dim, hidden=64):
    """Deterministic synthetic parameters (same shapes as the PyTorch module)."""
    k1, k2, k3, k4, k5, k6 = jax.random.split(key, 6)
    s1 = 1.0 / jnp.sqrt(state_dim)
    s2 = 1.0 / jnp.sqrt(hidden)
    return {
        "w1": jax.random.uniform(k1, (state_dim, hidden), jnp.float32, -s1, s1),
        "b1": jax.random.uniform(k2, (1, hidden), jnp.float32, -s1, s1),
        "w2": jax.random.uniform(k3, (hidden, hidden), jnp.float32, -s2, s2),
        "b2": jax.random.uniform(k4, (1, hidden), jnp.float32, -s2, s2),
        "w3": jax.random.uniform(k5, (hidden, action_dim), jnp.float32, -s2, s2),
        "b3": jax.random.uniform(k6, (1, action_dim), jnp.float32, -s2, s2),
    }


def reference_forward(x, p):
    h = jnp.maximum(x @ p["w1"] + p["b1"], 0.0)
    h = jnp.maximum(h @ p["w2"] + p["b2"], 0.0)
    return h @ p["w3"] + p["b3"]


if __name__ == "__main__":
    key = jax.random.PRNGKey(0)
    kx, kp = jax.random.split(key)

    # Large enough to exercise batch tiling: tile_b=128 -> grid=(2,), an even
    # "parallel" axis that pipelines and shards across v7x's 2 TensorCores.
    batch = 256
    state_dim = 32
    action_dim = 8

    x = jax.random.normal(kx, (batch, state_dim), dtype=jnp.float32)
    params = init_params(kp, state_dim, action_dim)

    # jit so the (tiny) weight casts fuse around the single pallas_call.
    fwd = jax.jit(simple_gnn_forward)

    out = jax.block_until_ready(fwd(x, params))
    ref = reference_forward(x, params)

    assert out.shape == (batch, action_dim)
    # bf16 MXU feeds with f32 accumulation: loosened tolerance vs f32 reference.
    # (Deliberate: near-tied Q-value argmax may differ from a pure-f32 model.)
    assert jnp.allclose(out, ref, atol=2e-2, rtol=2e-2), "mismatch vs JAX reference"

    # Also exercise the tiny-batch path (B=8 -> one grid step, no padding).
    # TODO(synk): at B~8 this is pure launch/DMA overhead; batch many graphs or
    # fuse this MLP into the surrounding GNN step before invoking it.
    x_small = x[:8]
    out_small = jax.block_until_ready(fwd(x_small, params))
    assert out_small.shape == (8, action_dim)
    assert jnp.allclose(out_small, ref[:8], atol=2e-2, rtol=2e-2), "small-batch mismatch"

    print("KERNEL_OK")
</pallas_src>

<mosaic_0001>
module attributes {stable_mosaic.version = 11 : i64} {
  func.func @_mlp_kernel(%arg0: i32, %arg1: memref<128x32xf32, #tpu.memory_space<vmem>>, %arg2: memref<32x64xbf16, #tpu.memory_space<vmem>>, %arg3: memref<1x64xf32, #tpu.memory_space<vmem>>, %arg4: memref<64x64xbf16, #tpu.memory_space<vmem>>, %arg5: memref<1x64xf32, #tpu.memory_space<vmem>>, %arg6: memref<64x8xbf16, #tpu.memory_space<vmem>>, %arg7: memref<1x8xf32, #tpu.memory_space<vmem>>, %arg8: memref<128x8xf32, #tpu.memory_space<vmem>>) attributes {dimension_semantics = [#tpu.dimension_semantics<parallel>], iteration_bounds = array<i64: 2>, scalar_prefetch = 0 : i64, scratch_operands = 0 : i64, tpu.core_type = #tpu.core_type<tc>, window_params = [{transform_indices = @transform_0, window_bounds = array<i64: 128, 32>}, {pipeline_mode = #tpu.pipeline_mode<synchronous>, transform_indices = @transform_1, window_bounds = array<i64: 32, 64>}, {pipeline_mode = #tpu.pipeline_mode<synchronous>, transform_indices = @transform_2, window_bounds = array<i64: 1, 64>}, {pipeline_mode = #tpu.pipeline_mode<synchronous>, transform_indices = @transform_3, window_bounds = array<i64: 64, 64>}, {pipeline_mode = #tpu.pipeline_mode<synchronous>, transform_indices = @transform_4, window_bounds = array<i64: 1, 64>}, {pipeline_mode = #tpu.pipeline_mode<synchronous>, transform_indices = @transform_5, window_bounds = array<i64: 64, 8>}, {pipeline_mode = #tpu.pipeline_mode<synchronous>, transform_indices = @transform_6, window_bounds = array<i64: 1, 8>}, {transform_indices = @transform_7, window_bounds = array<i64: 128, 8>}]} {
    %c0 = arith.constant 0 : index
    %c0_0 = arith.constant 0 : index
    %0 = vector.load %arg1[%c0, %c0_0] : memref<128x32xf32, #tpu.memory_space<vmem>>, vector<128x32xf32>
    %1 = arith.truncf %0 : vector<128x32xf32> to vector<128x32xbf16>
    %c0_1 = arith.constant 0 : index
    %c0_2 = arith.constant 0 : index
    %2 = vector.load %arg2[%c0_1, %c0_2] : memref<32x64xbf16, #tpu.memory_space<vmem>>, vector<32x64xbf16>
    %cst = arith.constant dense<0.000000e+00> : vector<128x64xf32>
    %3 = tpu.matmul %1, %2, %cst {dimension_numbers = #tpu.dot_dimension_numbers<[1], [0], [0], [1], [0, 0, 1, 1], [], []>} : vector<128x32xbf16>, vector<32x64xbf16>, vector<128x64xf32> -> vector<128x64xf32>
    %c0_3 = arith.constant 0 : index
    %c0_4 = arith.constant 0 : index
    %4 = vector.load %arg3[%c0_3, %c0_4] : memref<1x64xf32, #tpu.memory_space<vmem>>, vector<1x64xf32>
    %5 = vector.broadcast %4 : vector<1x64xf32> to vector<128x64xf32>
    %6 = arith.addf %3, %5 : vector<128x64xf32>
    %cst_5 = arith.constant 0.000000e+00 : f32
    %7 = vector.broadcast %cst_5 : f32 to vector<128x64xf32>
    %8 = arith.maximumf %6, %7 : vector<128x64xf32>
    %9 = arith.truncf %8 : vector<128x64xf32> to vector<128x64xbf16>
    %c0_6 = arith.constant 0 : index
    %c0_7 = arith.constant 0 : index
    %10 = vector.load %arg4[%c0_6, %c0_7] : memref<64x64xbf16, #tpu.memory_space<vmem>>, vector<64x64xbf16>
    %cst_8 = arith.constant dense<0.000000e+00> : vector<128x64xf32>
    %11 = tpu.matmul %9, %10, %cst_8 {dimension_numbers = #tpu.dot_dimension_numbers<[1], [0], [0], [1], [0, 0, 1, 1], [], []>} : vector<128x64xbf16>, vector<64x64xbf16>, vector<128x64xf32> -> vector<128x64xf32>
    %c0_9 = arith.constant 0 : index
    %c0_10 = arith.constant 0 : index
    %12 = vector.load %arg5[%c0_9, %c0_10] : memref<1x64xf32, #tpu.memory_space<vmem>>, vector<1x64xf32>
    %13 = vector.broadcast %12 : vector<1x64xf32> to vector<128x64xf32>
    %14 = arith.addf %11, %13 : vector<128x64xf32>
    %cst_11 = arith.constant 0.000000e+00 : f32
    %15 = vector.broadcast %cst_11 : f32 to vector<128x64xf32>
    %16 = arith.maximumf %14, %15 : vector<128x64xf32>
    %17 = arith.truncf %16 : vector<128x64xf32> to vector<128x64xbf16>
    %c0_12 = arith.constant 0 : index
    %c0_13 = arith.constant 0 : index
    %18 = vector.load %arg6[%c0_12, %c0_13] : memref<64x8xbf16, #tpu.memory_space<vmem>>, vector<64x8xbf16>
    %cst_14 = arith.constant dense<0.000000e+00> : vector<128x8xf32>
    %19 = tpu.matmul %17, %18, %cst_14 {dimension_numbers = #tpu.dot_dimension_numbers<[1], [0], [0], [1], [0, 0, 1, 1], [], []>} : vector<128x64xbf16>, vector<64x8xbf16>, vector<128x8xf32> -> vector<128x8xf32>
    %c0_15 = arith.constant 0 : index
    %c0_16 = arith.constant 0 : index
    %20 = vector.load %arg7[%c0_15, %c0_16] : memref<1x8xf32, #tpu.memory_space<vmem>>, vector<1x8xf32>
    %21 = vector.broadcast %20 : vector<1x8xf32> to vector<128x8xf32>
    %22 = arith.addf %19, %21 : vector<128x8xf32>
    %c0_17 = arith.constant 0 : index
    %c0_18 = arith.constant 0 : index
    %23 = vector.load %arg8[%c0_17, %c0_18] : memref<128x8xf32, #tpu.memory_space<vmem>>, vector<128x8xf32>
    tpu.vector_store %arg8[%c0_17, %c0_18], %22 {strides = array<i32>} : memref<128x8xf32, #tpu.memory_space<vmem>>, vector<128x8xf32>,
    return
  }
  func.func @transform_0(%arg0: i32) -> (i32, i32) {
    %c0_i32 = arith.constant 0 : i32
    %c0_i32_0 = arith.constant 0 : i32
    return %arg0, %c0_i32 : i32, i32
  }
  func.func @transform_1(%arg0: i32) -> (i32, i32) {
    %c0_i32 = arith.constant 0 : i32
    %c0_i32_0 = arith.constant 0 : i32
    %c0_i32_1 = arith.constant 0 : i32
    return %c0_i32, %c0_i32_0 : i32, i32
  }
  func.func @transform_2(%arg0: i32) -> (i32, i32) {
    %c0_i32 = arith.constant 0 : i32
    %c0_i32_0 = arith.constant 0 : i32
    %c0_i32_1 = arith.constant 0 : i32
    return %c0_i32, %c0_i32_0 : i32, i32
  }
  func.func @transform_3(%arg0: i32) -> (i32, i32) {
    %c0_i32 = arith.constant 0 : i32
    %c0_i32_0 = arith.constant 0 : i32
    %c0_i32_1 = arith.constant 0 : i32
    return %c0_i32, %c0_i32_0 : i32, i32
  }
  func.func @transform_4(%arg0: i32) -> (i32, i32) {
    %c0_i32 = arith.constant 0 : i32
    %c0_i32_0 = arith.constant 0 : i32
    %c0_i32_1 = arith.constant 0 : i32
    return %c0_i32, %c0_i32_0 : i32, i32
  }
  func.func @transform_5(%arg0: i32) -> (i32, i32) {
    %c0_i32 = arith.constant 0 : i32
    %c0_i32_0 = arith.constant 0 : i32
    %c0_i32_1 = arith.constant 0 : i32
    return %c0_i32, %c0_i32_0 : i32, i32
  }
  func.func @transform_6(%arg0: i32) -> (i32, i32) {
    %c0_i32 = arith.constant 0 : i32
    %c0_i32_0 = arith.constant 0 : i32
    %c0_i32_1 = arith.constant 0 : i32
    return %c0_i32, %c0_i32_0 : i32, i32
  }
  func.func @transform_7(%arg0: i32) -> (i32, i32) {
    %c0_i32 = arith.constant 0 : i32
    %c0_i32_0 = arith.constant 0 : i32
    return %arg0, %c0_i32 : i32, i32
  }
}

</mosaic_0001>

<bundles_post_ra>
// kernel: simple_gnn_forward.1
= control target key start
LH: loop header
LB: loop body
LE: loop exit
PB: predicated region body
PF: predicated region fallthrough
CT: control target
= control target key end

     0   :  { %s1114_s24 = smov 0   ;;  %s1253_s0 = inlined_call_operand.vmem [shape: f32[256,32], index: 0, kind: input, shape index: {}]   ;;  %s1254_s1 = inlined_call_operand.vmem [shape: bf16[32,64], index: 1, kind: input, shape index: {}]   ;;  %s1255_s2 = inlined_call_operand.vmem [shape: f32[1,64], index: 2, kind: input, shape index: {}]   ;;  %s1256_s3 = inlined_call_operand.vmem [shape: bf16[64,64], index: 3, kind: input, shape index: {}]   ;;  %s1257_s4 = inlined_call_operand.vmem [shape: f32[1,64], index: 4, kind: input, shape index: {}]   ;;  %s1258_s5 = inlined_call_operand.vmem [shape: bf16[64,8], index: 5, kind: input, shape index: {}]   ;;  %s1259_s6 = inlined_call_operand.vmem [shape: f32[1,8], index: 6, kind: input, shape index: {}]   ;;  %s1260_s7 = inlined_call_operand.vmem [shape: f32[256,8], index: 7, kind: output, shape index: {}]  }
   0x1 LB: > { %s894_s25 = sadd.s32 4294967295, %s1072_s24   ;;  %p898_p0 = scmp.ge.s32.totalorder %s1072_s24, 1  ;;  %s1072_s24 = sphi %s1114_s24, %s17_s24  }
   0x2   : > { %p238_p1 = scmp.lt.s32.totalorder %s1072_s24, 3 }
   0x4   : > { %p239_p2 = pnand %p898_p0, %p238_p1 }
   0x5   : > { %v1056_v0 = vld [vmem:[%s1254_s1] sm:$0xff] (!%p239_p2)   ;;  %s899_s28 = sshll.u32 (!%p239_p2), %s894_s25, 4  ;;  %v1057_v1 = vld [vmem:[%s1254_s1 + $0x8] sm:$0xff] (!%p239_p2)   ;;  %vm330_vm0 = vcmask (!%p239_p2), 261120   ;;  %v1060_v28 = vld [vmem:[%s1256_s3 + $0x10] sm:$0xff] (!%p239_p2)   ;;  %vm515_vm1 = vcmask (!%p239_p2), 523264  }
   0x6   : > { %242 = sbr.rel (%p239_p2) target bundleno = 706 (0x2c2), region = 48  ;;  %p271_p3 = scmp.lt.s32.totalorder (!%p239_p2), %s899_s28, 31  ;;  %976 = vmatprep.subr.bf16.mxu0 (!%p239_p2), %v1056_v0  ;;  %1044 = vmatprep.subr.bf16.mxu1 (!%p239_p2), %v1056_v0  ;;  %v1058_v2 = vld [vmem:[%s1256_s3] sm:$0xff] (!%p239_p2)   ;;  %v1059_v16 = vld [vmem:[%s1256_s3 + $0x8] sm:$0xff] (!%p239_p2)   ;;  %v1061_v29 = vld [vmem:[%s1256_s3 + $0x18] sm:$0xff] (!%p239_p2)   ;;  %vm821_vm2 = vcmask (!%p239_p2), 64512  }
   0x7   : > { %977 = vmatpush3.bf16.msra.mxu0 (!%p239_p2), %v1056_v0  ;;  %1046 = vmatpush3.bf16.msra.mxu1 (!%p239_p2), %v1056_v0  ;;  %v1062_v30 = vld [vmem:[%s1258_s5] sm:$0xff] (!%p239_p2)   ;;  %v1063_v31 = vld [vmem:[%s1258_s5 + $0x8] sm:$0xff] (!%p239_p2)  }
   0x8   : > { %978 = vmatprep.subr.bf16.mxu0 (!%p239_p2), %v1057_v1  ;;  %1045 = vmatprep.subr.bf16.mxu1 (!%p239_p2), %v1057_v1  ;;  %v903_v32 = vld [vmem:[%s1255_s2] ss:$0 sm:$0xff] (!%p239_p2) }
   0xb   : > { %979 = vmatpush3.bf16.msra.mxu0 (!%p239_p2), %v1057_v1  ;;  %1047 = vmatpush3.bf16.msra.mxu1 (!%p239_p2), %v1057_v1 }
   0xc   : > { %996 = vmatprep.subr.bf16.mxu1 (!%p239_p2), %v1058_v2  ;;  %1020 = vmatprep.subr.bf16.mxu0 (!%p239_p2), %v1062_v30 }
   0xd   : > { %s1262_s28 = smov (!%p271_p3, %s899_s28), 31 }
   0xe   : > { %s900_s10 = sshll.u32 %s1262_s28, 3 }
   0xf   : > { %s1139_s13 = scalar_lea.vmem %s1253_s0, %s900_s10  ;;  %s1216_s16 = scalar_lea.vmem %s1260_s7, %s900_s10 }
  0x10   : > { %v283_v3 = vld [vmem:[%s1139_s13] sm:$0xff]  ;;  %v284_v4 = vld [vmem:[%s1139_s13 + $0x8] sm:$0xff]  ;;  %v285_v5 = vld [vmem:[%s1139_s13 + $0x10] sm:$0xff] }
  0x11   : > { %v299_v6 = vpack.c.bf16 %v284_v4, %v283_v3  ;;  %v286_v7 = vld [vmem:[%s1139_s13 + $0x18] sm:$0xff]  ;;  %v287_v8 = vld [vmem:[%s1139_s13 + $0x20] sm:$0xff]  ;;  %v288_v9 = vld [vmem:[%s1139_s13 + $0x28] sm:$0xff] }
  0x12   : > { %v300_v10 = vpack.c.bf16 %v286_v7, %v285_v5  ;;  %v301_v11 = vpack.c.bf16 %v288_v9, %v287_v8  ;;  %v291_v12 = vld [vmem:[%s1139_s13 + $0x40] sm:$0xff]  ;;  %v292_v13 = vld [vmem:[%s1139_s13 + $0x48] sm:$0xff]  ;;  %v293_v14 = vld [vmem:[%s1139_s13 + $0x50] sm:$0xff] }
  0x13   : > { %980 = vmatprep.mubr.msk.bf16.mxu0 %vm330_vm0, %v299_v6  ;;  %v294_v15 = vld [vmem:[%s1139_s13 + $0x58] sm:$0xff]  ;;  %v289_v17 = vld [vmem:[%s1139_s13 + $0x30] sm:$0xff]  ;;  %v303_v18 = vpack.c.bf16 %v292_v13, %v291_v12  ;;  %v295_v20 = vld [vmem:[%s1139_s13 + $0x60] sm:$0xff] }
  0x14   : > { %981 = vmatmul.mubr.msk.bf16.vlgmr.msra.gmra.mrb[0].mxu0 %vm330_vm0, %v300_v10  ;;  %v304_v19 = vpack.c.bf16 %v294_v15, %v293_v14  ;;  %v296_v21 = vld [vmem:[%s1139_s13 + $0x68] sm:$0xff]  ;;  %v290_v22 = vld [vmem:[%s1139_s13 + $0x38] sm:$0xff]  ;;  %v297_v25 = vld [vmem:[%s1139_s13 + $0x70] sm:$0xff] }
  0x15   : > { %984 = vmatprep.mubr.msk.bf16.mxu0 %vm330_vm0, %v301_v11  ;;  %v305_v23 = vpack.c.bf16 %v296_v21, %v295_v20  ;;  %988 = vmatprep.mubr.msk.bf16.mxu1 %vm330_vm0, %v303_v18  ;;  %v302_v24 = vpack.c.bf16 %v290_v22, %v289_v17  ;;  %v298_v26 = vld [vmem:[%s1139_s13 + $0x78] sm:$0xff] }
  0x16   : > { %989 = vmatmul.mubr.msk.bf16.vlgmr.msra.gmra.mrb[0].mxu1 %vm330_vm0, %v304_v19  ;;  %v306_v27 = vpack.c.bf16 %v298_v26, %v297_v25  ;;  %1021 = vmatpush3.bf16.msra.mxu0 %v1062_v30  ;;  %v1064_v25 = vld [vmem:[%s1258_s5 + $0x10] sm:$0xff]   ;;  %v1065_v26 = vld [vmem:[%s1258_s5 + $0x18] sm:$0xff]  }
  0x17   : > { %992 = vmatprep.mubr.msk.bf16.mxu1 %vm330_vm0, %v305_v23  ;;  %997 = vmatpush3.bf16.msra.mxu1 %v1058_v2 }
  0x18   : > { %998 = vmatprep.subr.bf16.mxu1 %v1059_v16  ;;  %1022 = vmatprep.subr.bf16.mxu0 %v1063_v31 }
  0x1a   : > { %1023 = vmatpush3.bf16.msra.mxu0 %v1063_v31 }
  0x1b   : > { %999 = vmatpush3.bf16.msra.mxu1 %v1059_v16  ;;  %1024 = vmatprep.subr.bf16.mxu0 %v1064_v25 }
  0x1c   : > { %985 = vmatmul.mubr.msk.bf16.gmra.mrb[4].mxu0 %vm330_vm0, %v302_v24  ;;  %1000 = vmatprep.subr.bf16.mxu1 %v1060_v28 }
  0x1e   : > { %993 = vmatmul.mubr.msk.bf16.gmra.mrb[4].mxu1 %vm330_vm0, %v306_v27  ;;  %1025 = vmatpush3.bf16.msra.mxu0 %v1064_v25  ;;  %v914_v27 = vld [vmem:[%s1257_s4] ss:$0 sm:$0xff] }
  0x1f   : > { %1001 = vmatpush3.bf16.msra.mxu1 %v1060_v28  ;;  %1026 = vmatprep.subr.bf16.mxu0 %v1065_v26 }
  0x20   : > { %1002 = vmatprep.subr.bf16.mxu1 %v1061_v29 }
  0x22   : > { %1027 = vmatpush3.bf16.msra.mxu0 %v1065_v26 }
  0x23   : > { %1003 = vmatpush3.bf16.msra.mxu1 %v1061_v29 }
  0xe7   : > { %v982_v33 = vpop.f32.mrb[0].mxu0 }
  0xe8   : > { %v398_v34 = vadd.f32 %v982_v33, %v903_v32  ;;  %v389_v35 = vpop.f32.mrb[1].mxu0 }
  0xe9   : > { %v390_v36 = vadd.f32 %v903_v32, %v389_v35  ;;  %v983_v37 = vpop.f32.mrb[2].mxu0  ;;  %v990_v40 = vpop.f32.mrb[0].mxu1 }
  0xea   : > { %v401_v38 = vadd.f32 %v983_v37, %v903_v32  ;;  %v392_v39 = vpop.f32.mrb[3].mxu0  ;;  %v430_v42 = vadd.f32 %v990_v40, %v903_v32  ;;  %v421_v43 = vpop.f32.mrb[1].mxu1  ;;  %v454_v44 = vmax.f32 %v398_v34, 0.0 }
  0xeb   : > { %v393_v41 = vadd.f32 %v903_v32, %v392_v39  ;;  %v422_v46 = vadd.f32 %v903_v32, %v421_v43  ;;  %v991_v47 = vpop.f32.mrb[2].mxu1  ;;  %v452_v48 = vmax.f32 %v390_v36, 0.0 }
  0xec   : > { %v455_v45 = vmax.f32 %v401_v38, 0.0  ;;  %v462_v50 = vmax.f32 %v430_v42, 0.0  ;;  %v433_v51 = vadd.f32 %v991_v47, %v903_v32  ;;  %v424_v52 = vpop.f32.mrb[3].mxu1 }
  0xed   : > { %v453_v49 = vmax.f32 %v393_v41, 0.0  ;;  %v460_v54 = vmax.f32 %v422_v46, 0.0  ;;  %v425_v55 = vadd.f32 %v903_v32, %v424_v52 }
  0xee   : > { %v469_v53 = vpack.c.bf16 %v455_v45, %v454_v44  ;;  %v463_v58 = vmax.f32 %v433_v51, 0.0 }
  0xef   : > { %v468_v56 = vpack.c.bf16 %v453_v49, %v452_v48  ;;  %v986_v57 = vpop.f32.mrb[4].mxu0  ;;  %v461_v61 = vmax.f32 %v425_v55, 0.0 }
  0xf0   : > { %v414_v59 = vadd.f32 %v986_v57, %v903_v32  ;;  %v405_v60 = vpop.f32.mrb[5].mxu0  ;;  %v473_v0 = vpack.c.bf16 %v463_v58, %v462_v50 }
  0xf1   : > { %v406_v62 = vadd.f32 %v903_v32, %v405_v60  ;;  %v987_v63 = vpop.f32.mrb[6].mxu0  ;;  %1004 = vmatprep.mubr.msk.bf16.mxu1 %vm515_vm1, %v468_v56  ;;  %v472_v3 = vpack.c.bf16 %v461_v61, %v460_v54  ;;  %v994_v4 = vpop.f32.mrb[4].mxu1 }
  0xf2   : > { %v417_v1 = vadd.f32 %v987_v63, %v903_v32  ;;  %v408_v2 = vpop.f32.mrb[7].mxu0  ;;  %1005 = vmatmul.mubr.msk.bf16.vlgmr.msra.gmra.mrb[8].mxu1 %vm515_vm1, %v469_v53  ;;  %v446_v6 = vadd.f32 %v994_v4, %v903_v32  ;;  %v437_v7 = vpop.f32.mrb[5].mxu1  ;;  %v458_v8 = vmax.f32 %v414_v59, 0.0 }
  0xf3   : > { %v409_v5 = vadd.f32 %v903_v32, %v408_v2  ;;  %v438_v10 = vadd.f32 %v903_v32, %v437_v7  ;;  %v995_v11 = vpop.f32.mrb[6].mxu1  ;;  %v456_v12 = vmax.f32 %v406_v62, 0.0 }
  0xf4   : > { %v459_v9 = vmax.f32 %v417_v1, 0.0  ;;  %v466_v14 = vmax.f32 %v446_v6, 0.0  ;;  %v449_v15 = vadd.f32 %v995_v11, %v903_v32  ;;  %v440_v16 = vpop.f32.mrb[7].mxu1 }
  0xf5   : > { %v457_v13 = vmax.f32 %v409_v5, 0.0  ;;  %v464_v18 = vmax.f32 %v438_v10, 0.0  ;;  %v441_v19 = vadd.f32 %v903_v32, %v440_v16 }
  0xf6   : > { %v471_v17 = vpack.c.bf16 %v459_v9, %v458_v8  ;;  %v467_v21 = vmax.f32 %v449_v15, 0.0 }
  0xf7   : > { %v470_v20 = vpack.c.bf16 %v457_v13, %v456_v12  ;;  %v465_v22 = vmax.f32 %v441_v19, 0.0 }
  0xf8   : > { %v475_v23 = vpack.c.bf16 %v467_v21, %v466_v14 }
  0xf9   : > { %1008 = vmatprep.mubr.msk.bf16.mxu1 %vm515_vm1, %v470_v20  ;;  %v474_v24 = vpack.c.bf16 %v465_v22, %v464_v18  ;;  %v927_v20 = vld [vmem:[%s1259_s6] ss:$0 sm:$0xff] }
  0xfa   : > { %1009 = vmatmul.mubr.msk.bf16.gmra.mrb[12].mxu1 %vm515_vm1, %v471_v17 }
  0xfb   : > { %1012 = vmatprep.mubr.msk.bf16.mxu1 %vm515_vm1, %v472_v3 }
 0x102   : > { %1013 = vmatmul.mubr.msk.bf16.gmra.mrb[16].mxu1 %vm515_vm1, %v473_v0 }
 0x103   : > { %1016 = vmatprep.mubr.msk.bf16.mxu1 %vm515_vm1, %v474_v24 }
 0x10a   : > { %1017 = vmatmul.mubr.msk.bf16.gmra.mrb[20].mxu1 %vm515_vm1, %v475_v23 }
 0x1c5   : > { %v1006_v28 = vpop.f32.mrb[8].mxu1 }
 0x1c6   : > { %v583_v29 = vadd.f32 %v1006_v28, %v914_v27  ;;  %v574_v30 = vpop.f32.mrb[9].mxu1 }
 0x1c7   : > { %v575_v31 = vadd.f32 %v914_v27, %v574_v30  ;;  %v1007_v32 = vpop.f32.mrb[10].mxu1 }
 0x1c8   : > { %v586_v33 = vadd.f32 %v1007_v32, %v914_v27  ;;  %v577_v34 = vpop.f32.mrb[11].mxu1  ;;  %v639_v36 = vmax.f32 %v583_v29, 0.0 }
 0x1c9   : > { %v578_v35 = vadd.f32 %v914_v27, %v577_v34  ;;  %v637_v38 = vmax.f32 %v575_v31, 0.0 }
 0x1ca   : > { %v640_v37 = vmax.f32 %v586_v33, 0.0 }
 0x1cb   : > { %v638_v39 = vmax.f32 %v578_v35, 0.0 }
 0x1cc   : > { %v654_v40 = vpack.c.bf16 %v640_v37, %v639_v36 }
 0x1cd   : > { %v653_v41 = vpack.c.bf16 %v638_v39, %v637_v38  ;;  %v1010_v42 = vpop.f32.mrb[12].mxu1 }
 0x1ce   : > { %v599_v43 = vadd.f32 %v1010_v42, %v914_v27  ;;  %v590_v44 = vpop.f32.mrb[13].mxu1 }
 0x1cf   : > { %v591_v45 = vadd.f32 %v914_v27, %v590_v44  ;;  %v1011_v46 = vpop.f32.mrb[14].mxu1  ;;  %1028 = vmatprep.mubr.msk.bf16.mxu0 %vm515_vm1, %v653_v41 }
 0x1d0   : > { %v602_v47 = vadd.f32 %v1011_v46, %v914_v27  ;;  %v593_v48 = vpop.f32.mrb[15].mxu1  ;;  %1029 = vmatmul.mubr.msk.bf16.vlgmr.msra.gmra.mrb[8].mxu0 %vm515_vm1, %v654_v40  ;;  %v643_v50 = vmax.f32 %v599_v43, 0.0 }
 0x1d1   : > { %v594_v49 = vadd.f32 %v914_v27, %v593_v48  ;;  %v641_v52 = vmax.f32 %v591_v45, 0.0 }
 0x1d2   : > { %v644_v51 = vmax.f32 %v602_v47, 0.0 }
 0x1d3   : > { %v642_v53 = vmax.f32 %v594_v49, 0.0 }
 0x1d4   : > { %v656_v54 = vpack.c.bf16 %v644_v51, %v643_v50 }
 0x1d5   : > { %v655_v55 = vpack.c.bf16 %v642_v53, %v641_v52  ;;  %v1014_v56 = vpop.f32.mrb[16].mxu1 }
 0x1d6   : > { %v615_v57 = vadd.f32 %v1014_v56, %v914_v27  ;;  %v606_v58 = vpop.f32.mrb[17].mxu1 }
 0x1d7   : > { %v607_v59 = vadd.f32 %v914_v27, %v606_v58  ;;  %v1015_v60 = vpop.f32.mrb[18].mxu1  ;;  %1032 = vmatprep.mubr.msk.bf16.mxu0 %vm515_vm1, %v655_v55 }
 0x1d8   : > { %v618_v61 = vadd.f32 %v1015_v60, %v914_v27  ;;  %v609_v62 = vpop.f32.mrb[19].mxu1  ;;  %1033 = vmatmul.mubr.msk.bf16.gmra.mrb[12].mxu0 %vm515_vm1, %v656_v54  ;;  %v647_v0 = vmax.f32 %v615_v57, 0.0 }
 0x1d9   : > { %v610_v63 = vadd.f32 %v914_v27, %v609_v62  ;;  %v645_v2 = vmax.f32 %v607_v59, 0.0 }
 0x1da   : > { %v648_v1 = vmax.f32 %v618_v61, 0.0 }
 0x1db   : > { %v646_v3 = vmax.f32 %v610_v63, 0.0 }
 0x1dc   : > { %v658_v4 = vpack.c.bf16 %v648_v1, %v647_v0 }
 0x1dd   : > { %v657_v5 = vpack.c.bf16 %v646_v3, %v645_v2  ;;  %v1018_v6 = vpop.f32.mrb[20].mxu1 }
 0x1de   : > { %v631_v7 = vadd.f32 %v1018_v6, %v914_v27  ;;  %v622_v8 = vpop.f32.mrb[21].mxu1 }
 0x1df   : > { %v623_v9 = vadd.f32 %v914_v27, %v622_v8  ;;  %v1019_v10 = vpop.f32.mrb[22].mxu1  ;;  %1036 = vmatprep.mubr.msk.bf16.mxu0 %vm515_vm1, %v657_v5 }
 0x1e0   : > { %v634_v11 = vadd.f32 %v1019_v10, %v914_v27  ;;  %v625_v12 = vpop.f32.mrb[23].mxu1  ;;  %1037 = vmatmul.mubr.msk.bf16.gmra.mrb[16].mxu0 %vm515_vm1, %v658_v4  ;;  %v651_v14 = vmax.f32 %v631_v7, 0.0 }
 0x1e1   : > { %v626_v13 = vadd.f32 %v914_v27, %v625_v12  ;;  %v649_v16 = vmax.f32 %v623_v9, 0.0 }
 0x1e2   : > { %v652_v15 = vmax.f32 %v634_v11, 0.0 }
 0x1e3   : > { %v650_v17 = vmax.f32 %v626_v13, 0.0 }
 0x1e4   : > { %v660_v18 = vpack.c.bf16 %v652_v15, %v651_v14 }
 0x1e5   : > { %v659_v19 = vpack.c.bf16 %v650_v17, %v649_v16 }
 0x1e7   : > { %1040 = vmatprep.mubr.msk.bf16.mxu0 %vm515_vm1, %v659_v19 }
 0x1e8   : > { %1041 = vmatmul.mubr.msk.bf16.gmra.mrb[20].mxu0 %vm515_vm1, %v660_v18 }
 0x2a3   : > { %v1030_v21 = vpop.f32.mrb[8].mxu0 }
 0x2a4   : > { %v767_v22 = vadd.f32 %v1030_v21, %v927_v20  ;;  %v758_v23 = vpop.f32.mrb[9].mxu0 }
 0x2a5   : > { %v759_v24 = vadd.f32 %v927_v20, %v758_v23  ;;  %v1031_v25 = vpop.f32.mrb[10].mxu0 }
 0x2a6   : > { %824 = vst.msk [vmem:[%s1216_s16 + $0x10] sm:$0xff] %vm821_vm2, %v767_v22  ;;  %v770_v26 = vadd.f32 %v1031_v25, %v927_v20  ;;  %v761_v27 = vpop.f32.mrb[11].mxu0 }
 0x2a7   : > { %822 = vst.msk [vmem:[%s1216_s16] sm:$0xff] %vm821_vm2, %v759_v24  ;;  %v762_v28 = vadd.f32 %v927_v20, %v761_v27 }
 0x2a8   : > { %825 = vst.msk [vmem:[%s1216_s16 + $0x18] sm:$0xff] %vm821_vm2, %v770_v26 }
 0x2a9   : > { %823 = vst.msk [vmem:[%s1216_s16 + $0x8] sm:$0xff] %vm821_vm2, %v762_v28 }
 0x2ab   : > { %v1034_v29 = vpop.f32.mrb[12].mxu0 }
 0x2ac   : > { %v783_v30 = vadd.f32 %v1034_v29, %v927_v20  ;;  %v774_v31 = vpop.f32.mrb[13].mxu0 }
 0x2ad   : > { %v775_v32 = vadd.f32 %v927_v20, %v774_v31  ;;  %v1035_v33 = vpop.f32.mrb[14].mxu0 }
 0x2ae   : > { %828 = vst.msk [vmem:[%s1216_s16 + $0x30] sm:$0xff] %vm821_vm2, %v783_v30  ;;  %v786_v34 = vadd.f32 %v1035_v33, %v927_v20  ;;  %v777_v35 = vpop.f32.mrb[15].mxu0 }
 0x2af   : > { %826 = vst.msk [vmem:[%s1216_s16 + $0x20] sm:$0xff] %vm821_vm2, %v775_v32  ;;  %v778_v36 = vadd.f32 %v927_v20, %v777_v35 }
 0x2b0   : > { %829 = vst.msk [vmem:[%s1216_s16 + $0x38] sm:$0xff] %vm821_vm2, %v786_v34 }
 0x2b1   : > { %827 = vst.msk [vmem:[%s1216_s16 + $0x28] sm:$0xff] %vm821_vm2, %v778_v36 }
 0x2b3   : > { %v1038_v37 = vpop.f32.mrb[16].mxu0 }
 0x2b4   : > { %v799_v38 = vadd.f32 %v1038_v37, %v927_v20  ;;  %v790_v39 = vpop.f32.mrb[17].mxu0 }
 0x2b5   : > { %v791_v40 = vadd.f32 %v927_v20, %v790_v39  ;;  %v1039_v41 = vpop.f32.mrb[18].mxu0 }
 0x2b6   : > { %832 = vst.msk [vmem:[%s1216_s16 + $0x50] sm:$0xff] %vm821_vm2, %v799_v38  ;;  %v802_v42 = vadd.f32 %v1039_v41, %v927_v20  ;;  %v793_v43 = vpop.f32.mrb[19].mxu0 }
 0x2b7   : > { %830 = vst.msk [vmem:[%s1216_s16 + $0x40] sm:$0xff] %vm821_vm2, %v791_v40  ;;  %v794_v44 = vadd.f32 %v927_v20, %v793_v43 }
 0x2b8   : > { %833 = vst.msk [vmem:[%s1216_s16 + $0x58] sm:$0xff] %vm821_vm2, %v802_v42 }
 0x2b9   : > { %831 = vst.msk [vmem:[%s1216_s16 + $0x48] sm:$0xff] %vm821_vm2, %v794_v44 }
 0x2bb   : > { %v1042_v45 = vpop.f32.mrb[20].mxu0 }
 0x2bc   : > { %v815_v46 = vadd.f32 %v1042_v45, %v927_v20  ;;  %v806_v47 = vpop.f32.mrb[21].mxu0 }
 0x2bd   : > { %v807_v48 = vadd.f32 %v927_v20, %v806_v47  ;;  %v1043_v49 = vpop.f32.mrb[22].mxu0 }
 0x2be   : > { %836 = vst.msk [vmem:[%s1216_s16 + $0x70] sm:$0xff] %vm821_vm2, %v815_v46  ;;  %v818_v50 = vadd.f32 %v1043_v49, %v927_v20  ;;  %v809_v51 = vpop.f32.mrb[23].mxu0 }
 0x2bf   : > { %834 = vst.msk [vmem:[%s1216_s16 + $0x60] sm:$0xff] %vm821_vm2, %v807_v48  ;;  %v810_v52 = vadd.f32 %v927_v20, %v809_v51 }
 0x2c0   : > { %837 = vst.msk [vmem:[%s1216_s16 + $0x78] sm:$0xff] %vm821_vm2, %v818_v50 }
 0x2c1   : > { %835 = vst.msk [vmem:[%s1216_s16 + $0x68] sm:$0xff] %vm821_vm2, %v810_v52 }
 0x2c2 PF: > { %s17_s24 = sadd.s32 1, %s1072_s24  }
 0x2c3   : > { %p14_p4 = scmp.ge.s32.totalorder %s17_s24, 4  }
 0x2c5   :  { %16 = sbr.rel (!%p14_p4) target bundleno = 1 (0x1), region = 78 }

</bundles_post_ra>
